<compile_context>
chip_gen: v5e
topology: v5e:2x2
jax: 0.10.0
libtpu: 0.0.40
codegen_flags: <defaults>
</compile_context>

<pallas_src>
import jax
import jax.numpy as jnp
from jax.experimental import pallas as pl
from jax.experimental.pallas import tpu as pltpu

SIGMA = 2.0          # Gaussian splat radius (pixels)
EPS = 1e-6
SENTINEL = 1.0e9     # coordinate for padded vertices -> splat weight == 0


def _round_up(x, m):
    return ((x + m - 1) // m) * m


def _bf16_eup_supported():
    """bf16 transcendentals only help on v6e / v7x (v5e and older: f32)."""
    try:
        kind = jax.devices()[0].device_kind.lower()
    except Exception:
        return False
    for tag in ("v2", "v3", "v4", "v5"):
        if tag in kind:
            return False
    return True


def _make_kernel(W, tile_p, compute_dtype):
    neg_inv_two_sigma2 = -1.0 / (2.0 * SIGMA * SIGMA)

    def kernel(bg_ref, vyx_ref, col_ref, out_ref, acc_ref):
        k = pl.program_id(1)

        @pl.when(k == 0)
        def _init():
            acc_ref[...] = jnp.zeros_like(acc_ref)

        # ---- pixel coordinates for this tile, generated in-kernel ----------
        base = (pl.program_id(0) * tile_p).astype(jnp.float32)
        lane = jax.lax.broadcasted_iota(jnp.int32, (1, tile_p), 1)
        idx = base + lane.astype(jnp.float32)       # flat pixel index, exact
        # exact floor-divide / mod by W in f32 with a one-step correction
        q = jnp.floor(idx * (1.0 / W))
        r = idx - q * W
        q = jnp.where(r < 0.0, q - 1.0, q)
        r = jnp.where(r < 0.0, r + W, r)
        q = jnp.where(r >= W, q + 1.0, q)
        r = jnp.where(r >= W, r - W, r)
        py, px = q, r                               # (1, tile_p), row / col

        # ---- Gaussian splat weights for this vertex block (VPU + EUP) ------
        vy = vyx_ref[:, 0:1]                        # (tile_n, 1)
        vx = vyx_ref[:, 1:2]
        dy = py - vy                                # (tile_n, tile_p)
        dx = px - vx
        arg = (dy * dy + dx * dx) * neg_inv_two_sigma2
        w = jnp.exp(arg.astype(compute_dtype))      # bf16 EUP on v6e/v7x

        # rows 0..2: sum_n c[n,:] * w[n];  row 3: sum_n w[n] (ones row in col)
        acc_ref[...] += jnp.dot(col_ref[...], w,
                                preferred_element_type=jnp.float32)

        # ---- finalize: normalize, soft alpha, composite over bg ------------
        @pl.when(k == pl.num_programs(1) - 1)
        def _finalize():
            acc = acc_ref[...]                                   # (4, tile_p)
            wsum = acc[3:4, :]                                   # (1, tile_p)
            rgb = acc[0:3, :] * pl.reciprocal(wsum + EPS, approx=True)
            alpha = 1.0 - jnp.exp(-wsum)                         # rgba[...,3:]
            row = jax.lax.broadcasted_iota(jnp.int32, (3, 1), 0)
            bg = jnp.where(row == 0, bg_ref[0],
                           jnp.where(row == 1, bg_ref[1], bg_ref[2]))  # (3,1)
            # colorModel.forward (return_mask=False):
            #   out = rgb * mask + bg_color * (1 - mask)
            out_ref[...] = rgb * alpha + bg * (1.0 - alpha)

    return kernel


def color_model_forward(v, f, colors, bg_color, H, W, *,
                        tile_p=1024, tile_n=512, use_bf16_exp=None):
    """Pallas implementation of colorModel.forward(return_mask=False)."""
    # TODO(synk): the external triangle rasterizer (renderer.render) has no
    # clean Pallas equivalent; a Gaussian-splat renderer is used instead and
    # the faces `f` are therefore unused.
    del f
    N = int(v.shape[0])
    P = H * W

    if use_bf16_exp is None:
        use_bf16_exp = _bf16_eup_supported()
    compute_dtype = jnp.bfloat16 if use_bf16_exp else jnp.float32

    # ---- tile sizing (lane dims must be multiples of 128) ------------------
    tile_p = max(128, min(tile_p, _round_up(P, 128)))
    tile_p = _round_up(tile_p, 128)
    p_pad = _round_up(P, tile_p)

    if N <= tile_n:
        n_pad = _round_up(N, 8)
        tile_n = n_pad                      # single vertex block (full dim)
    else:
        tile_n = _round_up(tile_n, 128)
        n_pad = _round_up(N, tile_n)

    # Rough per-step VMEM footprint: (dy,dx,d2,w) intermediates, double
    # buffered input/output blocks, accumulator.  Keep well under the 32 MiB
    # scoped limit so the same tiling is safe on v5e/v6e/v7x.
    itemsize = jnp.dtype(compute_dtype).itemsize
    vmem_est = (4 * tile_n * tile_p * itemsize
                + 2 * (2 * tile_n * 4 + 4 * tile_n * itemsize)
                + 2 * 3 * tile_p * 4
                + 4 * tile_p * 4)
    assert vmem_est < 24 * 1024 * 1024, \
        "tile_p / tile_n too large for VMEM; reduce them"

    # ---- projection & padding (glue, runs in XLA) --------------------------
    v = v.astype(jnp.float32)
    vy = (v[:, 1] * 0.5 + 0.5) * (H - 1)
    vx = (v[:, 0] * 0.5 + 0.5) * (W - 1)
    vyx = jnp.stack([vy, vx], axis=1)                              # (N, 2)
    # padded vertices get far-away coordinates -> exactly zero splat weight
    vyx = jnp.pad(vyx, ((0, n_pad - N), (0, 0)), constant_values=SENTINEL)

    col = jnp.concatenate([colors.astype(jnp.float32).T,
                           jnp.ones((1, N), jnp.float32)], axis=0)  # (4, N)
    col = jnp.pad(col, ((0, 0), (0, n_pad - N)))                    # zeros
    col = col.astype(compute_dtype)

    bg = jnp.asarray(bg_color, jnp.float32).reshape(3)

    grid = (p_pad // tile_p, n_pad // tile_n)
    kernel = _make_kernel(W, tile_p, compute_dtype)

    out = pl.pallas_call(
        kernel,
        out_shape=jax.ShapeDtypeStruct((3, p_pad), jnp.float32),
        grid_spec=pltpu.PrefetchScalarGridSpec(
            num_scalar_prefetch=0,
            grid=grid,
            in_specs=[
                pl.BlockSpec(memory_space=pltpu.MemorySpace.SMEM),   # bg (3,)
                pl.BlockSpec((tile_n, 2), lambda i, k: (k, 0)),      # vert yx
                pl.BlockSpec((4, tile_n), lambda i, k: (0, k)),      # colors+1
            ],
            out_specs=pl.BlockSpec((3, tile_p), lambda i, k: (0, i)),
            scratch_shapes=[pltpu.VMEM((4, tile_p), jnp.float32)],
        ),
        compiler_params=pltpu.CompilerParams(
            dimension_semantics=("parallel", "arbitrary"),
            vmem_limit_bytes=32 * 1024 * 1024,
        ),
        cost_estimate=pl.CostEstimate(
            flops=14 * p_pad * n_pad,
            transcendentals=p_pad * n_pad + 2 * p_pad,
            bytes_accessed=4 * (3 * p_pad + 6 * n_pad + 3),
        ),
    )(bg, vyx, col)

    # lane-dense (3, P) -> channels-last (H, W, 3), matching rgba[..., :3]
    return out[:, :P].reshape(3, H, W).transpose(1, 2, 0)


if __name__ == "__main__":
    key = jax.random.PRNGKey(0)
    kv, kc = jax.random.split(key)

    # Small deterministic mesh / parameters consistent with colorModel.__init__:
    #   v: (N, 3) vertices, f: (F, 3) faces, colors: (N, 3) nn.Parameter.
    N, F, H, W = 8, 4, 16, 16
    v = jax.random.uniform(kv, (N, 3), minval=-1.0, maxval=1.0, dtype=jnp.float32)
    f = jnp.zeros((F, 3), dtype=jnp.int32)          # unused by synthetic renderer
    colors = jax.random.uniform(kc, (N, 3), dtype=jnp.float32)
    bg_color = jnp.array([1.0, 1.0, 1.0], dtype=jnp.float32)   # np.array([1,1,1])

    out = color_model_forward(v, f, colors, bg_color, H, W)
    jax.block_until_ready(out)
    assert out.shape == (H, W, 3) and out.dtype == jnp.float32
    assert bool(jnp.all(jnp.isfinite(out)))
    print("KERNEL_OK")
</pallas_src>

<mosaic_0001>
module attributes {stable_mosaic.version = 11 : i64} {
  func.func @kernel(%arg0: i32, %arg1: i32, %arg2: memref<3xf32, #tpu.memory_space<smem>>, %arg3: memref<8x2xf32, #tpu.memory_space<vmem>>, %arg4: memref<4x8xbf16, #tpu.memory_space<vmem>>, %arg5: memref<3x256xf32, #tpu.memory_space<vmem>>, %arg6: memref<4x256xf32, #tpu.memory_space<vmem>>) attributes {dimension_semantics = [#tpu.dimension_semantics<parallel>, #tpu.dimension_semantics<arbitrary>], iteration_bounds = array<i64: 1, 1>, scalar_prefetch = 0 : i64, scratch_operands = 1 : i64, tpu.core_type = #tpu.core_type<tc>, window_params = [{transform_indices = @transform_0, window_bounds = array<i64: 3>}, {transform_indices = @transform_1, window_bounds = array<i64: 8, 2>}, {transform_indices = @transform_2, window_bounds = array<i64: 4, 8>}, {transform_indices = @transform_3, window_bounds = array<i64: 3, 256>}]} {
    %c0_i32 = arith.constant 0 : i32
    %0 = arith.cmpi eq, %arg1, %c0_i32 : i32
    %1 = arith.extui %0 : i1 to i32
    %c0_i32_0 = arith.constant 0 : i32
    %2 = arith.cmpi ne, %1, %c0_i32_0 : i32
    scf.if %2 {
      %cst_22 = arith.constant 0.000000e+00 : f32
      %58 = vector.broadcast %cst_22 : f32 to vector<4x256xf32>
      %c0_23 = arith.constant 0 : index
      %c0_24 = arith.constant 0 : index
      %59 = vector.load %arg6[%c0_23, %c0_24] : memref<4x256xf32, #tpu.memory_space<vmem>>, vector<4x256xf32>
      tpu.vector_store %arg6[%c0_23, %c0_24], %58 {strides = array<i32>} : memref<4x256xf32, #tpu.memory_space<vmem>>, vector<4x256xf32>,
    } else {
    }
    %c256_i32 = arith.constant 256 : i32
    %3 = arith.muli %arg0, %c256_i32 : i32
    %4 = arith.sitofp %3 : i32 to f32
    %5 = tpu.iota {dimensions = array<i32: 1>} : vector<1x256xi32>
    %6 = arith.sitofp %5 : vector<1x256xi32> to vector<1x256xf32>
    %7 = vector.broadcast %4 : f32 to vector<1x256xf32>
    %8 = arith.addf %7, %6 : vector<1x256xf32>
    %cst = arith.constant 6.250000e-02 : f32
    %9 = vector.broadcast %cst : f32 to vector<1x256xf32>
    %10 = arith.mulf %8, %9 : vector<1x256xf32>
    %11 = math.floor %10 : vector<1x256xf32>
    %cst_1 = arith.constant 1.600000e+01 : f32
    %12 = vector.broadcast %cst_1 : f32 to vector<1x256xf32>
    %13 = arith.mulf %11, %12 : vector<1x256xf32>
    %14 = arith.subf %8, %13 : vector<1x256xf32>
    %cst_2 = arith.constant 0.000000e+00 : f32
    %15 = vector.broadcast %cst_2 : f32 to vector<1x256xf32>
    %16 = arith.cmpf olt, %14, %15 : vector<1x256xf32>
    %cst_3 = arith.constant 1.000000e+00 : f32
    %17 = vector.broadcast %cst_3 : f32 to vector<1x256xf32>
    %18 = arith.subf %11, %17 : vector<1x256xf32>
    %19 = arith.select %16, %18, %11 : vector<1x256xi1>, vector<1x256xf32>
    %cst_4 = arith.constant 0.000000e+00 : f32
    %20 = vector.broadcast %cst_4 : f32 to vector<1x256xf32>
    %21 = arith.cmpf olt, %14, %20 : vector<1x256xf32>
    %cst_5 = arith.constant 1.600000e+01 : f32
    %22 = vector.broadcast %cst_5 : f32 to vector<1x256xf32>
    %23 = arith.addf %14, %22 : vector<1x256xf32>
    %24 = arith.select %21, %23, %14 : vector<1x256xi1>, vector<1x256xf32>
    %cst_6 = arith.constant 1.600000e+01 : f32
    %25 = vector.broadcast %cst_6 : f32 to vector<1x256xf32>
    %26 = arith.cmpf oge, %24, %25 : vector<1x256xf32>
    %cst_7 = arith.constant 1.000000e+00 : f32
    %27 = vector.broadcast %cst_7 : f32 to vector<1x256xf32>
    %28 = arith.addf %19, %27 : vector<1x256xf32>
    %29 = arith.select %26, %28, %19 : vector<1x256xi1>, vector<1x256xf32>
    %cst_8 = arith.constant 1.600000e+01 : f32
    %30 = vector.broadcast %cst_8 : f32 to vector<1x256xf32>
    %31 = arith.cmpf oge, %24, %30 : vector<1x256xf32>
    %cst_9 = arith.constant 1.600000e+01 : f32
    %32 = vector.broadcast %cst_9 : f32 to vector<1x256xf32>
    %33 = arith.subf %24, %32 : vector<1x256xf32>
    %34 = arith.select %31, %33, %24 : vector<1x256xi1>, vector<1x256xf32>
    %c0 = arith.constant 0 : index
    %c0_10 = arith.constant 0 : index
    %35 = vector.load %arg3[%c0, %c0_10] : memref<8x2xf32, #tpu.memory_space<vmem>>, vector<8x1xf32>
    %c0_11 = arith.constant 0 : index
    %c1 = arith.constant 1 : index
    %36 = vector.load %arg3[%c0_11, %c1] : memref<8x2xf32, #tpu.memory_space<vmem>>, vector<8x1xf32>
    %37 = vector.broadcast %29 : vector<1x256xf32> to vector<8x256xf32>
    %38 = vector.broadcast %35 : vector<8x1xf32> to vector<8x256xf32>
    %39 = arith.subf %37, %38 : vector<8x256xf32>
    %40 = vector.broadcast %34 : vector<1x256xf32> to vector<8x256xf32>
    %41 = vector.broadcast %36 : vector<8x1xf32> to vector<8x256xf32>
    %42 = arith.subf %40, %41 : vector<8x256xf32>
    %43 = arith.mulf %39, %39 : vector<8x256xf32>
    %44 = arith.mulf %42, %42 : vector<8x256xf32>
    %45 = arith.addf %43, %44 : vector<8x256xf32>
    %cst_12 = arith.constant -1.250000e-01 : f32
    %46 = vector.broadcast %cst_12 : f32 to vector<8x256xf32>
    %47 = arith.mulf %45, %46 : vector<8x256xf32>
    %48 = arith.truncf %47 : vector<8x256xf32> to vector<8x256xbf16>
    %49 = math.exp %48 : vector<8x256xbf16>
    %c0_13 = arith.constant 0 : index
    %c0_14 = arith.constant 0 : index
    %50 = vector.load %arg6[%c0_13, %c0_14] : memref<4x256xf32, #tpu.memory_space<vmem>>, vector<4x256xf32>
    %c0_15 = arith.constant 0 : index
    %c0_16 = arith.constant 0 : index
    %51 = vector.load %arg4[%c0_15, %c0_16] : memref<4x8xbf16, #tpu.memory_space<vmem>>, vector<4x8xbf16>
    %cst_17 = arith.constant dense<0.000000e+00> : vector<4x256xf32>
    %52 = tpu.matmul %51, %49, %cst_17 {dimension_numbers = #tpu.dot_dimension_numbers<[1], [0], [0], [1], [0, 0, 1, 1], [], []>} : vector<4x8xbf16>, vector<8x256xbf16>, vector<4x256xf32> -> vector<4x256xf32>
    %53 = arith.addf %50, %52 : vector<4x256xf32>
    %c0_18 = arith.constant 0 : index
    %c0_19 = arith.constant 0 : index
    %54 = vector.load %arg6[%c0_18, %c0_19] : memref<4x256xf32, #tpu.memory_space<vmem>>, vector<4x256xf32>
    tpu.vector_store %arg6[%c0_18, %c0_19], %53 {strides = array<i32>} : memref<4x256xf32, #tpu.memory_space<vmem>>, vector<4x256xf32>,
    %c0_i32_20 = arith.constant 0 : i32
    %55 = arith.cmpi eq, %arg1, %c0_i32_20 : i32
    %56 = arith.extui %55 : i1 to i32
    %c0_i32_21 = arith.constant 0 : i32
    %57 = arith.cmpi ne, %56, %c0_i32_21 : i32
    scf.if %57 {
      %c0_22 = arith.constant 0 : index
      %c0_23 = arith.constant 0 : index
      %58 = vector.load %arg6[%c0_22, %c0_23] : memref<4x256xf32, #tpu.memory_space<vmem>>, vector<4x256xf32>
      %59 = vector.extract_strided_slice %58 {offsets = [3, 0], sizes = [1, 256], strides = [1, 1]} : vector<4x256xf32> to vector<1x256xf32>
      %60 = vector.extract_strided_slice %58 {offsets = [0, 0], sizes = [3, 256], strides = [1, 1]} : vector<4x256xf32> to vector<3x256xf32>
      %cst_24 = arith.constant 9.99999997E-7 : f32
      %61 = vector.broadcast %cst_24 : f32 to vector<1x256xf32>
      %62 = arith.addf %59, %61 : vector<1x256xf32>
      %63 = tpu.reciprocal %62 {approx = true} : vector<1x256xf32> -> vector<1x256xf32>
      %64 = vector.broadcast %63 : vector<1x256xf32> to vector<3x256xf32>
      %65 = arith.mulf %60, %64 : vector<3x256xf32>
      %cst_25 = arith.constant 0.000000e+00 : f32
      %66 = vector.broadcast %cst_25 : f32 to vector<1x256xf32>
      %67 = arith.subf %66, %59 : vector<1x256xf32>
      %68 = math.exp %67 : vector<1x256xf32>
      %cst_26 = arith.constant 1.000000e+00 : f32
      %69 = vector.broadcast %cst_26 : f32 to vector<1x256xf32>
      %70 = arith.subf %69, %68 : vector<1x256xf32>
      %71 = tpu.iota {dimensions = array<i32: 0>} : vector<3x1xi32>
      %c0_i32_27 = arith.constant 0 : i32
      %72 = vector.broadcast %c0_i32_27 : i32 to vector<3x1xi32>
      %73 = arith.cmpi eq, %71, %72 : vector<3x1xi32>
      %c0_28 = arith.constant 0 : index
      %74 = memref.load %arg2[%c0_28] : memref<3xf32, #tpu.memory_space<smem>>
      %c1_i32 = arith.constant 1 : i32
      %75 = vector.broadcast %c1_i32 : i32 to vector<3x1xi32>
      %76 = arith.cmpi eq, %71, %75 : vector<3x1xi32>
      %c1_29 = arith.constant 1 : index
      %77 = memref.load %arg2[%c1_29] : memref<3xf32, #tpu.memory_space<smem>>
      %c2 = arith.constant 2 : index
      %78 = memref.load %arg2[%c2] : memref<3xf32, #tpu.memory_space<smem>>
      %79 = vector.broadcast %77 : f32 to vector<3x1xf32>
      %80 = vector.broadcast %78 : f32 to vector<3x1xf32>
      %81 = arith.select %76, %79, %80 : vector<3x1xi1>, vector<3x1xf32>
      %82 = vector.broadcast %74 : f32 to vector<3x1xf32>
      %83 = arith.select %73, %82, %81 : vector<3x1xi1>, vector<3x1xf32>
      %84 = vector.broadcast %70 : vector<1x256xf32> to vector<3x256xf32>
      %85 = arith.mulf %65, %84 : vector<3x256xf32>
      %cst_30 = arith.constant 1.000000e+00 : f32
      %86 = vector.broadcast %cst_30 : f32 to vector<1x256xf32>
      %87 = arith.subf %86, %70 : vector<1x256xf32>
      %88 = vector.broadcast %83 : vector<3x1xf32> to vector<3x256xf32>
      %89 = vector.broadcast %87 : vector<1x256xf32> to vector<3x256xf32>
      %90 = arith.mulf %88, %89 : vector<3x256xf32>
      %91 = arith.addf %85, %90 : vector<3x256xf32>
      %c0_31 = arith.constant 0 : index
      %c0_32 = arith.constant 0 : index
      %92 = vector.load %arg5[%c0_31, %c0_32] : memref<3x256xf32, #tpu.memory_space<vmem>>, vector<3x256xf32>
      tpu.vector_store %arg5[%c0_31, %c0_32], %91 {strides = array<i32>} : memref<3x256xf32, #tpu.memory_space<vmem>>, vector<3x256xf32>,
    } else {
    }
    return
  }
  func.func @transform_0(%arg0: i32, %arg1: i32) -> i32 {
    %c0_i32 = arith.constant 0 : i32
    %c0_i32_0 = arith.constant 0 : i32
    return %c0_i32 : i32
  }
  func.func @transform_1(%arg0: i32, %arg1: i32) -> (i32, i32) {
    %c0_i32 = arith.constant 0 : i32
    %c0_i32_0 = arith.constant 0 : i32
    return %arg1, %c0_i32 : i32, i32
  }
  func.func @transform_2(%arg0: i32, %arg1: i32) -> (i32, i32) {
    %c0_i32 = arith.constant 0 : i32
    %c0_i32_0 = arith.constant 0 : i32
    return %c0_i32, %arg1 : i32, i32
  }
  func.func @transform_3(%arg0: i32, %arg1: i32) -> (i32, i32) {
    %c0_i32 = arith.constant 0 : i32
    %c0_i32_0 = arith.constant 0 : i32
    return %c0_i32, %arg0 : i32, i32
  }
}

</mosaic_0001>

<bundles_post_ra>
// kernel: tpu_custom_call.1
= control target key start
LH: loop header
LB: loop body
LE: loop exit
PB: predicated region body
PF: predicated region fallthrough
CT: control target
= control target key end

     0   :  { %8 = vsyncpa [#allocation5], 0  ;;  %s338_s0 = inlined_call_operand.vmem [shape: f32[3], index: 0, kind: input, shape index: {}]   ;;  %s339_s1 = inlined_call_operand.vmem [shape: f32[8,2], index: 1, kind: input, shape index: {}]   ;;  %s340_s2 = inlined_call_operand.vmem [shape: bf16[4,8], index: 2, kind: input, shape index: {}]   ;;  %s341_s3 = inlined_call_operand.hbm [shape: f32[3,256], index: 3, kind: output, shape index: {}]  }
   0x1   :  { %9 = vsyncpa [#allocation4], 0  ;;  %s15_s14 = sshll.u32 %s338_s0, 4  ;;  %s294_s15 = smov [#allocation3]   ;;  %s16_s14 = int_to_ptr.vmem [resolvable:$true] %s15_s14 }
   0x2   :  { %18 = dma.vmem_to_smem %s16_s14, 16, %s294_s15, [#allocation5]  }
   0x3   :  { %290 = dma.done.wait [#allocation5], 16  }
   0x4   :  { %291 = vsyncadd [#allocation5], 4294967280 }
   0x5   :  { %27 = sfence }
   0x6   :  { %v72_v0 = vld [vmem:[%s339_s1] sm:$0xff]  ;;  %v295_v1 = vmov 0   ;;  %v296_v2 = vmov 1   ;;  %v36_v3 = vlaneseq  ;;  %vm110_vm4 = vcmask 1043456   ;;  %s238_s18 = sld [smem:[#allocation3 + $0x1]]  ;;  %s297_s20 = smov [#allocation6]  }
   0x7   :  { %244 = vset.pattern.permute.xlu0 %v295_v1  ;;  %v105_v58 = vld [vmem:[%s340_s2] sm:$0x3]  ;;  %vm106_vm5 = vcmask 64512   ;;  %s239_s19 = sld [smem:[#allocation3 + $0x2]]  ;;  %s220_s21 = sshll.u32 %s297_s20, 4  ;;  %s221_s21 = int_to_ptr.vmem [resolvable:$true] %s220_s21 }
   0x8   :  { %75 = vperm.xlu0 %244, %v72_v0   ;;  %v37_v4 = vand.u32 127, %v36_v3  ;;  %s176_s2 = sld [smem:[#allocation3]]  ;;  %s222_s24 = sshll.u32 %s341_s3, 4  ;;  %s223_s24 = int_to_ptr.hbm [resolvable:$true] %s222_s24 }
   0xa   :  { %v38_v5 = vadd.s32 128, %v37_v4  ;;  %v39_v6 = vcvt.s32.f32 %v37_v4 }
   0xc   :  { %v40_v7 = vcvt.s32.f32 %v38_v5  ;;  %v44_v8 = vmul.f32 0.0625, %v39_v6  ;;  %v174_v5 = vshrl.u32 %v36_v3, 7 }
   0xe   :  { %v45_v9 = vmul.f32 0.0625, %v40_v7  ;;  %v46_v10 = vfloor.f32 %v44_v8  ;;  %vm177_vm6 = vcmp.eq.s32.totalorder %v174_v5, 1  ;;  %vm175_vm7 = vcmp.eq.s32.totalorder %v174_v5, 0 }
  0x10   :  { %245 = vset.pattern.permute.xlu0 %v296_v2  ;;  %v47_v11 = vfloor.f32 %v45_v9  ;;  %v48_v12 = vmul.f32 16.0, %v46_v10  ;;  %v232_v16 = vadd.f32 -1.0, %v46_v10 }
  0x11   :  { %81 = vperm.xlu0 %245, %v72_v0  }
  0x12   :  { %v49_v13 = vmul.f32 16.0, %v47_v11  ;;  %v50_v14 = vsub.f32 %v39_v6, %v48_v12  ;;  %v233_v17 = vadd.f32 -1.0, %v47_v11  ;;  %v181_v12 = vstv %s239_s19 }
  0x14   :  { %v51_v15 = vsub.f32 %v40_v7, %v49_v13  ;;  %vm52_vm0 = vcmp.lt.f32.partialorder %v50_v14, 0.0  ;;  %v58_v18 = vadd.f32 16.0, %v50_v14 }
  0x15   :  { %v56_v20 = vsel %vm52_vm0, %v232_v16, %v46_v10 }
  0x16   :  { %vm53_vm1 = vcmp.lt.f32.partialorder %v51_v15, 0.0  ;;  %v59_v19 = vadd.f32 16.0, %v51_v15  ;;  %v60_v22 = vsel %vm52_vm0, %v58_v18, %v50_v14  ;;  %v64_v25 = vadd.f32 1.0, %v56_v20 }
  0x17   :  { %v57_v21 = vsel %vm53_vm1, %v233_v17, %v47_v11  ;;  %vm62_vm2 = vcmp.ge.f32.partialorder %v60_v22, 16.0  ;;  %v234_v27 = vadd.f32 -16.0, %v60_v22  ;;  %v180_v11 = vstv %s238_s18 }
  0x18   :  { %v61_v23 = vsel %vm53_vm1, %v59_v19, %v51_v15  ;;  %v65_v26 = vadd.f32 1.0, %v57_v21  ;;  %v66_v29 = vsel %vm62_vm2, %v64_v25, %v56_v20  ;;  %v182_v17 = vsel %vm177_vm6, %v180_v11, %v181_v12 }
  0x19   :  { %vm63_vm3 = vcmp.ge.f32.partialorder %v61_v23, 16.0  ;;  %v235_v28 = vadd.f32 -16.0, %v61_v23  ;;  %v70_v31 = vsel %vm62_vm2, %v234_v27, %v60_v22  ;;  %v183_v18 = vstv %s176_s2 }
  0x1a   :  { %v67_v30 = vsel %vm63_vm3, %v65_v26, %v57_v21 }
  0x1b   :  { %v71_v32 = vsel %vm63_vm3, %v235_v28, %v61_v23  ;;  %v184_v23 = vsel %vm175_vm7, %v183_v18, %v182_v17 }
  0x7a   :  { %v76_v24 = vpop.permute.xlu0 %75 }
  0x7b   :  { %v78_v33 = vsub.f32 %v66_v29, %v76_v24  ;;  %v79_v34 = vsub.f32 %v67_v30, %v76_v24 }
  0x7d   :  { %v86_v38 = vmul.f32 %v78_v33, %v78_v33  ;;  %v87_v39 = vmul.f32 %v79_v34, %v79_v34 }
  0x83   :  { %v82_v35 = vpop.permute.xlu0 %81 }
  0x84   :  { %v84_v36 = vsub.f32 %v70_v31, %v82_v35  ;;  %v85_v37 = vsub.f32 %v71_v32, %v82_v35 }
  0x86   :  { %v88_v40 = vmul.f32 %v84_v36, %v84_v36  ;;  %v89_v41 = vmul.f32 %v85_v37, %v85_v37 }
  0x88   :  { %v90_v42 = vadd.f32 %v88_v40, %v86_v38  ;;  %v91_v43 = vadd.f32 %v89_v41, %v87_v39 }
  0x8a   :  { %v92_v44 = vmul.f32 -0.125, %v90_v42  ;;  %v93_v45 = vmul.f32 -0.125, %v91_v43 }
  0x8c   :  { %v94_v46 = vpack.c.bf16 %v92_v44, %v92_v44  ;;  %v95_v47 = vpack.c.bf16 %v93_v45, %v93_v45 }
  0x8e   :  { %v96_v48 = vunpack.c.l.bf16 %v94_v46  ;;  %v97_v49 = vunpack.c.l.bf16 %v95_v47 }
  0x90   :  { %v98_v50 = vmul.f32 1.442695, %v96_v48  ;;  %v100_v51 = vmul.f32 1.442695, %v97_v49 }
  0x92   :  { %246 = vpow2.f32 %v98_v50 }
  0x93   :  { %248 = vpow2.f32 %v100_v51 }
  0x98   :  { %v247_v52 = vpop.eup %246 }
  0x99   :  { %v249_v53 = vpop.eup %248  ;;  %v102_v54 = vpack.c.bf16 %v247_v52, %v247_v52 }
  0x9a   :  { %v103_v55 = vpack.c.bf16 %v249_v53, %v249_v53 }
  0x9b   :  { %v112_v56 = vsel %vm110_vm4, %v102_v54, 0 }
  0x9c   :  { %124 = vmatpush.bf16.msra.mxu0 %v112_v56  ;;  %v115_v57 = vsel %vm110_vm4, %v103_v55, 0 }
  0x9d   :  { %137 = vmatpush.bf16.msra.mxu1 %v115_v57 }
  0x9f   :  { %236 = vmatmul.msk.bf16.vlgmr.msra.gmra.mxu0 %vm106_vm5, %v105_v58 }
  0xa0   :  { %237 = vmatmul.msk.bf16.vlgmr.msra.gmra.mxu1 %vm106_vm5, %v105_v58 }
 0x11c   :  { %v126_v59 = vpop.f32.mrf.mxu0 }
 0x11d   :  { %v139_v60 = vpop.f32.mrf.mxu1 }
 0x11e   :  { %v145_v61 = vrot.slane %v139_v60, 4 }
 0x120   :  { %v146_v62 = vsel %vm110_vm4, %v126_v59, %v145_v61 }
 0x121   :  { %v154_v63 = vadd.f32 1e-06, %v146_v62  ;;  %v169_v0 = vsub.f32 0.0, %v146_v62 }
 0x123   :  { %250 = vrcp.f32 %v154_v63  ;;  %v170_v1 = vmul.f32 1.442695, %v169_v0 }
 0x124   :  { %v128_v2 = vpop.f32.mrf.mxu0 }
 0x125   :  { %252 = vpow2.f32 %v170_v1  ;;  %v141_v4 = vpop.f32.mrf.mxu1 }
 0x129   :  { %v251_v6 = vpop.eup %250 }
 0x12a   :  { %v158_v7 = vperm.slane %v251_v6, 7  ;;  %v157_v13 = vperm.slane %v251_v6, 3 }
 0x12b   :  { %v253_v8 = vpop.eup %252 }
 0x12c   :  { %v172_v9 = vsub.f32 1.0, %v253_v8  ;;  %v162_v10 = vperm.slane %v158_v7, 3  ;;  %v161_v3 = vperm.slane %v157_v13, 3 }
 0x12e   :  { %v187_v14 = vperm.slane %v172_v9, 7  ;;  %v198_v15 = vsub.f32 1.0, %v172_v9  ;;  %v165_v16 = vrot.slane %v162_v10, 4  ;;  %v186_v19 = vperm.slane %v172_v9, 3 }
 0x130   :  { %v191_v20 = vperm.slane %v187_v14, 3  ;;  %v200_v21 = vperm.slane %v198_v15, 3  ;;  %v201_v22 = vperm.slane %v198_v15, 7  ;;  %v166_v25 = vsel %vm110_vm4, %v161_v3, %v165_v16 }
 0x131   :  { %v190_v26 = vperm.slane %v186_v19, 3  ;;  %v168_v31 = vmul.f32 %v166_v25, %v146_v62 }
 0x132   :  { %v194_v24 = vrot.slane %v191_v20, 4  ;;  %v204_v27 = vperm.slane %v200_v21, 3  ;;  %v205_v28 = vperm.slane %v201_v22, 3 }
 0x134   :  { %v195_v29 = vsel %vm110_vm4, %v190_v26, %v194_v24  ;;  %v207_v30 = vmul.f32 %v205_v28, %v184_v23  ;;  %v206_v32 = vmul.f32 %v204_v27, %v184_v23 }
 0x135   :  { %v197_v34 = vmul.f32 %v195_v29, %v168_v31 }
 0x136   :  { %v210_v33 = vrot.slane %v207_v30, 4 }
 0x138   :  { %v211_v35 = vsel %vm110_vm4, %v206_v32, %v210_v33 }
 0x139   :  { %v213_v36 = vadd.f32 %v211_v35, %v197_v34 }
 0x13b   :  { %214 = vst [vmem:[#allocation6] sm:$0x77] %v213_v36 }
 0x13c   :  { %225 = dma.vmem_to_hbm [thread:$0]  %s221_s21, 128, %s223_s24, [#allocation4]  }
 0x13d   :  { %292 = dma.done.wait [#allocation4], 128  }
 0x13e   :  { %293 = vsyncadd [#allocation4], 4294967168 }
 0x13f   :  { %230 = vsyncpa [#allocation4], 1 }
 0x140   :  { %231 = vsyncpa [#allocation5], 1 }

</bundles_post_ra>
